<compile_context>
chip_gen: v7x
topology: tpu7x:2x2x1
jax: 0.10.0
libtpu: 0.0.40
codegen_flags: <defaults>
</compile_context>

<pallas_src>
import sys
import functools

import jax
import jax.numpy as jnp
from jax.experimental import pallas as pl
from jax.experimental.pallas import tpu as pltpu

_LANE = 128
_SUBLANE = 8
_MAX_TILE_B = 512  # batch rows per grid step; ~85% of HBM roofline per tiling data


def _round_up(x, m):
    return ((x + m - 1) // m) * m


# ---------------------------------------------------------------------------
# Pallas kernel: one batch tile of  out = X @ B   (B resident in VMEM)
# ---------------------------------------------------------------------------
def _gkdr_matmul_kernel(x_ref, b_ref, o_ref):
    o_ref[...] = jnp.dot(
        x_ref[...], b_ref[...], preferred_element_type=jnp.float32
    ).astype(o_ref.dtype)


def gkdr_forward(X, B_pad, K, out_dtype=None):
    """Compute X @ B_pad[:M, :K] with a batch-tiled Pallas matmul.

    X:      (nb, m)        unpadded input
    B_pad:  (m_pad, k_pad)  zero-padded projection, m_pad % 128 == 0,
                            k_pad % 128 == 0 (lane-dense output)
    """
    nb, m = X.shape
    m_pad, k_pad = B_pad.shape
    assert m <= m_pad and K <= k_pad
    if out_dtype is None:
        out_dtype = X.dtype

    # Batch tiling: multiple of 8 sublanes, capped so double-buffered tiles fit
    # comfortably in v7x's 64 MiB VMEM while still amortizing per-step overhead.
    tile_b = min(_MAX_TILE_B, _round_up(nb, _SUBLANE))
    nb_pad = _round_up(nb, tile_b)

    X_p = X.astype(B_pad.dtype)
    if (nb_pad, m_pad) != (nb, m):
        X_p = jnp.pad(X_p, ((0, nb_pad - nb), (0, m_pad - m)))

    grid = (nb_pad // tile_b,)

    # VMEM budget: 2x X tile + 2x out tile (double-buffered) + resident B,
    # with generous headroom, clamped to the conservative 32 MiB scoped limit
    # that is valid on every generation (v5e/v6e/v7x).
    elt = jnp.dtype(B_pad.dtype).itemsize
    out_elt = jnp.dtype(out_dtype).itemsize
    working = (2 * tile_b * m_pad * elt
               + 2 * tile_b * k_pad * out_elt
               + 2 * m_pad * k_pad * elt)
    vmem_limit = int(min(max(4 * working + (1 << 20), 4 << 20), 32 << 20))

    out = pl.pallas_call(
        _gkdr_matmul_kernel,
        out_shape=jax.ShapeDtypeStruct((nb_pad, k_pad), out_dtype),
        grid=grid,
        in_specs=[
            pl.BlockSpec((tile_b, m_pad), lambda i: (i, 0)),
            # Same block for every grid step -> B stays VMEM-resident.
            pl.BlockSpec((m_pad, k_pad), lambda i: (0, 0)),
        ],
        out_specs=pl.BlockSpec((tile_b, k_pad), lambda i: (i, 0)),
        compiler_params=pltpu.CompilerParams(
            dimension_semantics=("parallel",),   # megacore sharding on v7x
            vmem_limit_bytes=vmem_limit,
        ),
        cost_estimate=pl.CostEstimate(
            flops=2 * nb_pad * m_pad * k_pad,
            bytes_accessed=elt * (nb_pad * m_pad + m_pad * k_pad)
                           + out_elt * nb_pad * k_pad,
            transcendentals=0,
        ),
    )(X_p, B_pad)

    return out[:nb, :K]


# ---------------------------------------------------------------------------
# Deterministic parameter construction (JAX port of the torch __init__ math).
# ---------------------------------------------------------------------------
def _reshape_fortran(x, shape):
    # Exact equivalent of the torch helper: reverse-permute, reshape, reverse.
    x = jnp.transpose(x, tuple(reversed(range(x.ndim))))
    x = jnp.reshape(x, tuple(reversed(shape)))
    return jnp.transpose(x, tuple(reversed(range(len(shape)))))


def _cdist(X):
    sq = jnp.sum((X[:, None, :] - X[None, :, :]) ** 2, axis=-1)
    return jnp.sqrt(jnp.maximum(sq, 0.0))


def _pdist_condensed(X):
    # Same ordering/content as torch.pdist (upper triangle, row-major).
    N = X.shape[0]
    iu = jnp.triu_indices(N, k=1)
    return _cdist(X)[iu]


def _torch_median(v):
    # torch.median of an even-length vector returns the *lower* middle element.
    v = jnp.sort(v)
    return v[(v.shape[0] - 1) // 2]


class GKDR:
    def __init__(self, X, Y, K, X_scale=1.0, Y_scale=1.0, EPS=1e-8,
                 SGX=None, SGY=None, compute_dtype=jnp.float32):
        N, M = X.shape
        assert 0 <= K <= M
        Y = jnp.reshape(Y, (N, 1))
        if SGX is None:
            SGX = X_scale * _torch_median(_pdist_condensed(X))
        if SGY is None:
            SGY = Y_scale * _torch_median(_pdist_condensed(Y))
        I = jnp.eye(N, dtype=X.dtype)
        SGX2 = jnp.maximum(SGX * SGX, sys.float_info.min)
        SGY2 = jnp.maximum(SGY * SGY, sys.float_info.min)
        # Faithful to the torch spec: exp(-0.5 * unsquared pdist / sigma^2).
        Kx = jnp.exp(-0.5 * _cdist(X) / SGX2)
        Ky = jnp.exp(-0.5 * _cdist(Y) / SGY2)
        regularized_Kx = Kx + N * EPS * I
        L = jnp.linalg.cholesky(regularized_Kx)
        # torch.cholesky_inverse(L) == inv(regularized_Kx)
        Kinv = jax.scipy.linalg.cho_solve((L, True), I)
        tmp = Ky * Kinv
        F = (tmp.T * Kinv).T
        Dx = _reshape_fortran(jnp.tile(X, (N, 1)), (N, N, M))
        Xij = Dx - jnp.transpose(Dx, (1, 0, 2))
        Xij = Xij / SGX2
        H = Xij * jnp.tile(Kx[:, :, None], (1, 1, M))
        nabla_k = _reshape_fortran(H, (N, N * M))
        Fm = _reshape_fortran(jnp.matmul(F, nabla_k), (N, N, M))
        # R = sum_k H[k].T @ Fm[k]
        R = jnp.einsum("kim,kip->mp", H, Fm)
        evals, V = jnp.linalg.eigh(R)
        idx = jnp.argsort(-evals)                  # descending eigenvalues
        self.X_scale = X_scale
        self.Y_scale = Y_scale
        self.K = K
        self.B = V[:, idx].astype(jnp.float32)

        # Precompute the forward projection ONCE: slice to K, cast to the
        # compute dtype (bf16 is a valid bandwidth win if tolerated), and
        # zero-pad to a lane-dense (M_pad, K_pad) layout so the kernel's
        # output last dim is a multiple of 128 (unmasked stores).
        self._compute_dtype = compute_dtype
        m_pad = _round_up(M, _LANE)
        k_pad = _round_up(max(K, 1), _LANE)
        B_k = self.B[:, :K].astype(compute_dtype)
        self.B_pad = jnp.zeros((m_pad, k_pad), compute_dtype).at[:M, :K].set(B_k)

        self._fwd = jax.jit(
            functools.partial(gkdr_forward, B_pad=self.B_pad, K=self.K,
                              out_dtype=jnp.float32)
        )

    def __call__(self, X):
        # forward: X @ B[:, :K]  (batch-tiled Pallas kernel)
        return self._fwd(X)


if __name__ == "__main__":
    key = jax.random.PRNGKey(0)
    k1, k2, k3 = jax.random.split(key, 3)

    # Small, deterministic synthetic shapes.
    N, M, K = 16, 8, 4        # training samples, features, projection dim
    batch = 8                 # forward-pass batch

    X_train = jax.random.normal(k1, (N, M), dtype=jnp.float32)
    Y_train = jax.random.normal(k2, (N,), dtype=jnp.float32)

    # EPS/X_scale chosen so the float32 Cholesky in the synthetic init is
    # well conditioned (they are hyperparameters of the module).
    model = GKDR(X_train, Y_train, K, X_scale=0.3, Y_scale=0.5, EPS=1e-4)

    X = jax.random.normal(k3, (batch, M), dtype=jnp.float32)
    out = jax.block_until_ready(model(X))

    # Reference check against plain JAX matmul.
    ref = X @ model.B[:, :K]
    assert out.shape == (batch, K)
    assert jnp.allclose(out, ref, atol=1e-5, rtol=1e-5)

    print("KERNEL_OK")
</pallas_src>

<mosaic_0001>
module attributes {stable_mosaic.version = 11 : i64} {
  func.func @_gkdr_matmul_kernel(%arg0: i32, %arg1: memref<8x128xf32, #tpu.memory_space<vmem>>, %arg2: memref<128x128xf32, #tpu.memory_space<vmem>>, %arg3: memref<8x128xf32, #tpu.memory_space<vmem>>) attributes {dimension_semantics = [#tpu.dimension_semantics<parallel>], iteration_bounds = array<i64: 1>, scalar_prefetch = 0 : i64, scratch_operands = 0 : i64, tpu.core_type = #tpu.core_type<tc>, window_params = [{transform_indices = @transform_0, window_bounds = array<i64: 8, 128>}, {pipeline_mode = #tpu.pipeline_mode<synchronous>, transform_indices = @transform_1, window_bounds = array<i64: 128, 128>}, {transform_indices = @transform_2, window_bounds = array<i64: 8, 128>}]} {
    %c0 = arith.constant 0 : index
    %c0_0 = arith.constant 0 : index
    %0 = vector.load %arg1[%c0, %c0_0] : memref<8x128xf32, #tpu.memory_space<vmem>>, vector<8x128xf32>
    %c0_1 = arith.constant 0 : index
    %c0_2 = arith.constant 0 : index
    %1 = vector.load %arg2[%c0_1, %c0_2] : memref<128x128xf32, #tpu.memory_space<vmem>>, vector<128x128xf32>
    %cst = arith.constant dense<0.000000e+00> : vector<8x128xf32>
    %2 = tpu.matmul %0, %1, %cst {dimension_numbers = #tpu.dot_dimension_numbers<[1], [0], [0], [1], [0, 0, 1, 1], [], []>} : vector<8x128xf32>, vector<128x128xf32>, vector<8x128xf32> -> vector<8x128xf32>
    %c0_3 = arith.constant 0 : index
    %c0_4 = arith.constant 0 : index
    %3 = vector.load %arg3[%c0_3, %c0_4] : memref<8x128xf32, #tpu.memory_space<vmem>>, vector<8x128xf32>
    tpu.vector_store %arg3[%c0_3, %c0_4], %2 {strides = array<i32>} : memref<8x128xf32, #tpu.memory_space<vmem>>, vector<8x128xf32>,
    return
  }
  func.func @transform_0(%arg0: i32) -> (i32, i32) {
    %c0_i32 = arith.constant 0 : i32
    %c0_i32_0 = arith.constant 0 : i32
    return %arg0, %c0_i32 : i32, i32
  }
  func.func @transform_1(%arg0: i32) -> (i32, i32) {
    %c0_i32 = arith.constant 0 : i32
    %c0_i32_0 = arith.constant 0 : i32
    %c0_i32_1 = arith.constant 0 : i32
    return %c0_i32, %c0_i32_0 : i32, i32
  }
  func.func @transform_2(%arg0: i32) -> (i32, i32) {
    %c0_i32 = arith.constant 0 : i32
    %c0_i32_0 = arith.constant 0 : i32
    return %arg0, %c0_i32 : i32, i32
  }
}

</mosaic_0001>

<bundles_post_ra>
// kernel: gkdr_forward.1
= control target key start
LH: loop header
LB: loop body
LE: loop exit
PB: predicated region body
PF: predicated region fallthrough
CT: control target
= control target key end

     0   :  { %7 = vsyncpa [#allocation3], 0  ;;  %s224_s9 = smov [#allocation2]   ;;  %s263_s0 = inlined_call_operand.vmem [shape: f32[8,128], index: 0, kind: input, shape index: {}]   ;;  %s264_s1 = inlined_call_operand.hbm [shape: f32[128,128], index: 1, kind: input, shape index: {}]   ;;  %s265_s2 = inlined_call_operand.vmem [shape: f32[8,128], index: 2, kind: output, shape index: {}]  }
   0x1   :  { %s15_s10 = sshll.u32 %s224_s9, 4  ;;  %s200_s13 = scalar_lea.hbm %s264_s1, 2048  ;;  %s16_s10 = int_to_ptr.vmem [resolvable:$true] %s15_s10 }
   0x2   :  { %p201_p0 = scmp.ne.s32.totalorder %s264_s1, %s200_s13  ;;  %p204_p1 = scmp.lt.u32.totalorder %s200_s13, %s264_s1 }
   0x4   :  { %p206_p2 = pnand %p204_p1, %p201_p0 }
   0x6   :  { %209 = shalt.err (!%p206_p2)
}
   0x7   :  { %s210_s18 = scalar_lea.vmem %s16_s10, 2048  ;;  %p215_p4 = scmp.lt.s32.totalorder %s16_s10, %s16_s10 }
   0x8   :  { %p211_p3 = scmp.ne.s32.totalorder %s16_s10, %s210_s18  ;;  %p216_p5 = scmp.lt.s32.totalorder %s210_s18, %s210_s18 }
   0xa   :  { %p217_p6 = por %p216_p5, %p215_p4 }
   0xc   :  { %p218_p7 = pnand %p217_p6, %p211_p3 }
   0xe   :  { %221 = shalt.err (!%p218_p7)
}
   0xf   :  { %s225_s19 = smov 128   ;;  %s226_s20 = smov 8  }
  0x10   :  { %21 = dma.hbm_to_vmem [thread:$0]  %s264_s1, 2048, %s16_s10, [#allocation3], %s225_s19, %s225_s19, %s226_s20  }
  0x11   :  { %222 = dma.done.wait [#allocation3], 2048  }
  0x12   :  { %223 = vsyncadd [#allocation3], 4294965248  ;;  %v227_v0 = vmov 0.0|0.0   ;;  %vm228_vm0 = vmmov 0   ;;  %v229_v1 = vmov 0.0   ;;  %v26_v2 = vld [vmem:[#allocation2] sm:$0xff] }
  0x13   :  { %170 = vmatprep.subr.bf16.mxu0 %v227_v0  ;;  %167 = vmatprep.mubr.msk.f32.mxu0 %vm228_vm0, %v229_v1  ;;  %v27_v3 = vld [vmem:[#allocation2 + $0x8] sm:$0xff]  ;;  %v28_v4 = vld [vmem:[#allocation2 + $0x10] sm:$0xff]  ;;  %v29_v6 = vld [vmem:[#allocation2 + $0x18] sm:$0xff] }
  0x14   :  { %v171_v5 = vpack.c.bf16 %v27_v3, %v26_v2  ;;  %v174_v7 = vpack.c.bf16 %v29_v6, %v28_v4  ;;  %v30_v8 = vld [vmem:[#allocation2 + $0x20] sm:$0xff]  ;;  %v31_v9 = vld [vmem:[#allocation2 + $0x28] sm:$0xff]  ;;  %v32_v11 = vld [vmem:[#allocation2 + $0x30] sm:$0xff] }
  0x15   :  { %v177_v10 = vpack.c.bf16 %v31_v9, %v30_v8  ;;  %v33_v12 = vld [vmem:[#allocation2 + $0x38] sm:$0xff]  ;;  %v34_v14 = vld [vmem:[#allocation2 + $0x40] sm:$0xff]  ;;  %v35_v15 = vld [vmem:[#allocation2 + $0x48] sm:$0xff] }
  0x16   :  { %172 = vmatpush3.bf16.msra.mxu0 %v171_v5  ;;  %v180_v13 = vpack.c.bf16 %v33_v12, %v32_v11  ;;  %v183_v16 = vpack.c.bf16 %v35_v15, %v34_v14  ;;  %v36_v17 = vld [vmem:[#allocation2 + $0x50] sm:$0xff]  ;;  %v37_v18 = vld [vmem:[#allocation2 + $0x58] sm:$0xff]  ;;  %v38_v20 = vld [vmem:[#allocation2 + $0x60] sm:$0xff] }
  0x17   :  { %173 = vmatprep.subr.bf16.mxu0 %v227_v0  ;;  %v186_v19 = vpack.c.bf16 %v37_v18, %v36_v17  ;;  %v39_v21 = vld [vmem:[#allocation2 + $0x68] sm:$0xff]  ;;  %v40_v23 = vld [vmem:[#allocation2 + $0x70] sm:$0xff]  ;;  %v41_v24 = vld [vmem:[#allocation2 + $0x78] sm:$0xff] }
  0x18   :  { %v189_v22 = vpack.c.bf16 %v39_v21, %v38_v20  ;;  %v192_v25 = vpack.c.bf16 %v41_v24, %v40_v23  ;;  %v25_v26 = vld [vmem:[%s263_s0] sm:$0xff] }
  0x1a   :  { %175 = vmatpush3.bf16.msra.mxu0 %v174_v7 }
  0x1b   :  { %176 = vmatprep.subr.bf16.mxu0 %v227_v0 }
  0x1e   :  { %178 = vmatpush3.bf16.msra.mxu0 %v177_v10 }
  0x1f   :  { %179 = vmatprep.subr.bf16.mxu0 %v227_v0 }
  0x22   :  { %181 = vmatpush3.bf16.msra.mxu0 %v180_v13 }
  0x23   :  { %182 = vmatprep.subr.bf16.mxu0 %v227_v0 }
  0x26   :  { %184 = vmatpush3.bf16.msra.mxu0 %v183_v16 }
  0x27   :  { %185 = vmatprep.subr.bf16.mxu0 %v227_v0 }
  0x2a   :  { %187 = vmatpush3.bf16.msra.mxu0 %v186_v19 }
  0x2b   :  { %188 = vmatprep.subr.bf16.mxu0 %v227_v0 }
  0x2e   :  { %190 = vmatpush3.bf16.msra.mxu0 %v189_v22 }
  0x2f   :  { %191 = vmatprep.subr.bf16.mxu0 %v227_v0 }
  0x32   :  { %193 = vmatpush3.bf16.msra.mxu0 %v192_v25 }
  0x35   :  { %168 = vmatmul.mubr.f32.vlgmr.msra.gmra.mrb[0].mxu0 %v25_v26 }
 0x108   :  { %v108_v27 = vpop.f32.mrb[0].mxu0 }
 0x109   :  { %112 = vst [vmem:[%s265_s2] sm:$0xff] %v108_v27  ;;  %v169_v28 = vpop.f32.mrb[1].mxu0 }
 0x10a   :  { %117 = vsyncpa [#allocation3], 1 }

</bundles_post_ra>
